<compile_context>
chip_gen: v6e
topology: v6e:2x2x1
jax: 0.10.0
libtpu: 0.0.40
codegen_flags: <defaults>
</compile_context>

<pallas_src>
import jax
import jax.numpy as jnp
from jax.experimental import pallas as pl
from jax.experimental.pallas import tpu as pltpu


def _round_up(n, m):
    return (n + m - 1) // m * m


def _cdiv(a, b):
    return (a + b - 1) // b


def _policy_kernel(x_ref, w1_ref, b1_ref, w2_ref, b2_ref, o_ref):
    # x_ref: (TB, D) f32 -> cast to bf16 in-register (hidden under the matmul).
    x = x_ref[...].astype(w1_ref.dtype)

    # Layer 1 (NdLinear == Linear on last axis) + ReLU, f32 accumulate.
    h = jnp.dot(x, w1_ref[...], preferred_element_type=jnp.float32) + b1_ref[...]
    h = jnp.maximum(h, 0.0)                                   # (TB, Hp) f32

    # Layer 2: bf16 MXU operand, f32 accumulate.  b2 already carries -1e30 in
    # the padded output lanes, so their exp underflows to 0 below (no explicit
    # mask needed).
    logits = jnp.dot(h.astype(w2_ref.dtype), w2_ref[...],
                     preferred_element_type=jnp.float32) + b2_ref[...]

    # Numerically stable softmax, exact f32 normalization (the approx
    # reciprocal's ~1e-3 error is visible in row sums).
    m = jnp.max(logits, axis=-1, keepdims=True)
    e = jnp.exp(logits - m)
    denom = jnp.sum(e, axis=-1, keepdims=True)
    o_ref[...] = (e / denom).astype(o_ref.dtype)


def prepare_params(w1, b1, w2, b2):
    """One-time padding / bf16 cast of the weights (hoisted out of the per-step path).

    Zero padding is mathematically inert:
      - padded hidden cols get zero weight + zero bias -> relu(0) = 0 -> hit
        zero W2 rows,
      - padded output cols get zero W2 columns and a -1e30 bias, which is the
        softmax mask for free (exp underflows to 0 against any real row max).
    """
    D, H = w1.shape
    O = w2.shape[1]
    Hp, Op = _round_up(H, 128), _round_up(O, 128)

    w1p = jnp.zeros((D, Hp), jnp.bfloat16).at[:, :H].set(w1.astype(jnp.bfloat16))
    b1p = jnp.zeros((1, Hp), jnp.float32).at[:, :H].set(
        jnp.reshape(b1, (1, H)).astype(jnp.float32))
    w2p = jnp.zeros((Hp, Op), jnp.bfloat16).at[:H, :O].set(w2.astype(jnp.bfloat16))
    b2p = jnp.full((1, Op), -1e30, jnp.float32).at[:, :O].set(
        jnp.reshape(b2, (1, O)).astype(jnp.float32))
    return (w1p, b1p, w2p, b2p, O)


def ndlinear_policy(x, params, *, block_b=512):
    """softmax(relu(x @ w1 + b1) @ w2 + b2, axis=-1) via one fused Pallas kernel."""
    w1p, b1p, w2p, b2p, O = params
    B, D = x.shape
    Hp = w1p.shape[1]
    Op = w2p.shape[1]

    # Balanced batch tiles on the 8-sublane grain (caps padding waste at one
    # sublane group).  For batches big enough to share, force >= 2 grid steps
    # so the "parallel" axis can shard across v7x's two TensorCores.
    nb_target = max(1, _cdiv(B, block_b))
    if B > 256:
        nb_target = max(nb_target, 2)
    TB = min(_round_up(_cdiv(B, nb_target), 8), _round_up(B, 8))
    nb = _cdiv(B, TB)

    # VMEM budget: resident weights/biases counted at 2x (BlockSpec
    # double-buffers even constant-index blocks), double-buffered x / out
    # tiles, plus the in-kernel f32 hidden, bf16 hidden copy, and f32
    # logits/exp temporaries.  1.5x headroom, capped generation-aware with
    # room left for compiler internal scratch.
    vmem_bytes = (
        2 * ((w1p.size + w2p.size) * 2 + (b1p.size + b2p.size) * 4)
        + 2 * TB * D * 4          # double-buffered f32 x tiles
        + 2 * TB * Op * 4         # double-buffered f32 out tiles
        + TB * Hp * (4 + 2)       # f32 hidden + bf16 MXU copy
        + 2 * TB * Op * 4         # f32 logits + exp temporaries
    )
    try:
        phys_vmem = int(pltpu.get_tpu_info().vmem_capacity_bytes)
    except Exception:
        phys_vmem = 64 << 20
    cap = int(phys_vmem * 0.8)
    vmem_limit = int(min(max(int(vmem_bytes * 1.5), 4 << 20), cap))

    out = pl.pallas_call(
        _policy_kernel,
        out_shape=jax.ShapeDtypeStruct((B, Op), jnp.float32),
        grid=(nb,),
        in_specs=[
            pl.BlockSpec((TB, D), lambda i: (i, 0)),    # x: batch-tiled, no pre-pad/cast
            pl.BlockSpec((D, Hp), lambda i: (0, 0)),    # W1: VMEM-resident
            pl.BlockSpec((1, Hp), lambda i: (0, 0)),    # b1: resident
            pl.BlockSpec((Hp, Op), lambda i: (0, 0)),   # W2: resident
            pl.BlockSpec((1, Op), lambda i: (0, 0)),    # b2: resident (carries pad mask)
        ],
        out_specs=pl.BlockSpec((TB, Op), lambda i: (i, 0)),
        compiler_params=pltpu.CompilerParams(
            dimension_semantics=("parallel",),
            vmem_limit_bytes=vmem_limit,
        ),
    )(x, w1p, b1p, w2p, b2p)

    # Drop only the padded output lanes (batch is not padded in HBM).
    return out[:, :O]


def init_params(key, input_dim, hidden_dim, output_dim):
    # Deterministic synthetic init (PyTorch-Linear-like uniform(-1/sqrt(fan_in), ..)).
    k1, k2, k3, k4 = jax.random.split(key, 4)
    s1 = 1.0 / jnp.sqrt(input_dim)
    s2 = 1.0 / jnp.sqrt(hidden_dim)
    w1 = jax.random.uniform(k1, (input_dim, hidden_dim), jnp.float32, -s1, s1)
    b1 = jax.random.uniform(k2, (1, hidden_dim), jnp.float32, -s1, s1)
    w2 = jax.random.uniform(k3, (hidden_dim, output_dim), jnp.float32, -s2, s2)
    b2 = jax.random.uniform(k4, (1, output_dim), jnp.float32, -s2, s2)
    return w1, b1, w2, b2


if __name__ == "__main__":
    input_dim, hidden_dim, output_dim = 16, 32, 8
    batch = 8

    key = jax.random.PRNGKey(0)
    kx, kp = jax.random.split(key)
    x = jax.random.normal(kx, (batch, input_dim), jnp.float32)
    w1, b1, w2, b2 = init_params(kp, input_dim, hidden_dim, output_dim)

    params = prepare_params(w1, b1, w2, b2)          # one-time pad/cast
    out = jax.block_until_ready(ndlinear_policy(x, params))

    # Pure-JAX reference mirroring the kernel's bf16 MXU operand rounding.
    xb = x.astype(jnp.bfloat16).astype(jnp.float32)
    w1b = w1.astype(jnp.bfloat16).astype(jnp.float32)
    w2b = w2.astype(jnp.bfloat16).astype(jnp.float32)
    h_ref = jnp.maximum(xb @ w1b + b1, 0.0)
    hb = h_ref.astype(jnp.bfloat16).astype(jnp.float32)
    ref = jax.nn.softmax(hb @ w2b + b2, axis=-1)

    assert out.shape == (batch, output_dim)
    max_err = float(jnp.max(jnp.abs(out - ref)))
    assert max_err < 5e-3, f"max abs err {max_err}"
    rowsum_err = float(jnp.max(jnp.abs(jnp.sum(out, axis=-1) - 1.0)))
    assert rowsum_err < 1e-3, f"row-sum err {rowsum_err}"

    print("KERNEL_OK")
</pallas_src>

<mosaic_0001>
module attributes {stable_mosaic.version = 11 : i64} {
  func.func @_policy_kernel(%arg0: i32, %arg1: memref<8x16xf32, #tpu.memory_space<vmem>>, %arg2: memref<16x128xbf16, #tpu.memory_space<vmem>>, %arg3: memref<1x128xf32, #tpu.memory_space<vmem>>, %arg4: memref<128x128xbf16, #tpu.memory_space<vmem>>, %arg5: memref<1x128xf32, #tpu.memory_space<vmem>>, %arg6: memref<8x128xf32, #tpu.memory_space<vmem>>) attributes {dimension_semantics = [#tpu.dimension_semantics<parallel>], iteration_bounds = array<i64: 1>, scalar_prefetch = 0 : i64, scratch_operands = 0 : i64, tpu.core_type = #tpu.core_type<tc>, window_params = [{transform_indices = @transform_0, window_bounds = array<i64: 8, 16>}, {pipeline_mode = #tpu.pipeline_mode<synchronous>, transform_indices = @transform_1, window_bounds = array<i64: 16, 128>}, {pipeline_mode = #tpu.pipeline_mode<synchronous>, transform_indices = @transform_2, window_bounds = array<i64: 1, 128>}, {pipeline_mode = #tpu.pipeline_mode<synchronous>, transform_indices = @transform_3, window_bounds = array<i64: 128, 128>}, {pipeline_mode = #tpu.pipeline_mode<synchronous>, transform_indices = @transform_4, window_bounds = array<i64: 1, 128>}, {transform_indices = @transform_5, window_bounds = array<i64: 8, 128>}]} {
    %c0 = arith.constant 0 : index
    %c0_0 = arith.constant 0 : index
    %0 = vector.load %arg1[%c0, %c0_0] : memref<8x16xf32, #tpu.memory_space<vmem>>, vector<8x16xf32>
    %1 = arith.truncf %0 : vector<8x16xf32> to vector<8x16xbf16>
    %c0_1 = arith.constant 0 : index
    %c0_2 = arith.constant 0 : index
    %2 = vector.load %arg2[%c0_1, %c0_2] : memref<16x128xbf16, #tpu.memory_space<vmem>>, vector<16x128xbf16>
    %cst = arith.constant dense<0.000000e+00> : vector<8x128xf32>
    %3 = tpu.matmul %1, %2, %cst {dimension_numbers = #tpu.dot_dimension_numbers<[1], [0], [0], [1], [0, 0, 1, 1], [], []>} : vector<8x16xbf16>, vector<16x128xbf16>, vector<8x128xf32> -> vector<8x128xf32>
    %c0_3 = arith.constant 0 : index
    %c0_4 = arith.constant 0 : index
    %4 = vector.load %arg3[%c0_3, %c0_4] : memref<1x128xf32, #tpu.memory_space<vmem>>, vector<1x128xf32>
    %5 = vector.broadcast %4 : vector<1x128xf32> to vector<8x128xf32>
    %6 = arith.addf %3, %5 : vector<8x128xf32>
    %cst_5 = arith.constant 0.000000e+00 : f32
    %7 = vector.broadcast %cst_5 : f32 to vector<8x128xf32>
    %8 = arith.maximumf %6, %7 : vector<8x128xf32>
    %9 = arith.truncf %8 : vector<8x128xf32> to vector<8x128xbf16>
    %c0_6 = arith.constant 0 : index
    %c0_7 = arith.constant 0 : index
    %10 = vector.load %arg4[%c0_6, %c0_7] : memref<128x128xbf16, #tpu.memory_space<vmem>>, vector<128x128xbf16>
    %cst_8 = arith.constant dense<0.000000e+00> : vector<8x128xf32>
    %11 = tpu.matmul %9, %10, %cst_8 {dimension_numbers = #tpu.dot_dimension_numbers<[1], [0], [0], [1], [0, 0, 1, 1], [], []>} : vector<8x128xbf16>, vector<128x128xbf16>, vector<8x128xf32> -> vector<8x128xf32>
    %c0_9 = arith.constant 0 : index
    %c0_10 = arith.constant 0 : index
    %12 = vector.load %arg5[%c0_9, %c0_10] : memref<1x128xf32, #tpu.memory_space<vmem>>, vector<1x128xf32>
    %13 = vector.broadcast %12 : vector<1x128xf32> to vector<8x128xf32>
    %14 = arith.addf %11, %13 : vector<8x128xf32>
    %cst_11 = arith.constant dense<0xFF800000> : vector<8xf32>
    %15 = vector.multi_reduction <maximumf>, %14, %cst_11 [1] : vector<8x128xf32> to vector<8xf32>
    %16 = vector.shape_cast %15 : vector<8xf32> to vector<8x1xf32>
    %17 = vector.broadcast %16 : vector<8x1xf32> to vector<8x128xf32>
    %18 = arith.subf %14, %17 : vector<8x128xf32>
    %19 = math.exp %18 : vector<8x128xf32>
    %cst_12 = arith.constant dense<0.000000e+00> : vector<8xf32>
    %20 = vector.multi_reduction <add>, %19, %cst_12 [1] : vector<8x128xf32> to vector<8xf32>
    %21 = vector.shape_cast %20 : vector<8xf32> to vector<8x1xf32>
    %22 = vector.broadcast %21 : vector<8x1xf32> to vector<8x128xf32>
    %23 = arith.divf %19, %22 : vector<8x128xf32>
    %c0_13 = arith.constant 0 : index
    %c0_14 = arith.constant 0 : index
    %24 = vector.load %arg6[%c0_13, %c0_14] : memref<8x128xf32, #tpu.memory_space<vmem>>, vector<8x128xf32>
    tpu.vector_store %arg6[%c0_13, %c0_14], %23 {strides = array<i32>} : memref<8x128xf32, #tpu.memory_space<vmem>>, vector<8x128xf32>,
    return
  }
  func.func @transform_0(%arg0: i32) -> (i32, i32) {
    %c0_i32 = arith.constant 0 : i32
    %c0_i32_0 = arith.constant 0 : i32
    return %arg0, %c0_i32 : i32, i32
  }
  func.func @transform_1(%arg0: i32) -> (i32, i32) {
    %c0_i32 = arith.constant 0 : i32
    %c0_i32_0 = arith.constant 0 : i32
    %c0_i32_1 = arith.constant 0 : i32
    return %c0_i32, %c0_i32_0 : i32, i32
  }
  func.func @transform_2(%arg0: i32) -> (i32, i32) {
    %c0_i32 = arith.constant 0 : i32
    %c0_i32_0 = arith.constant 0 : i32
    %c0_i32_1 = arith.constant 0 : i32
    return %c0_i32, %c0_i32_0 : i32, i32
  }
  func.func @transform_3(%arg0: i32) -> (i32, i32) {
    %c0_i32 = arith.constant 0 : i32
    %c0_i32_0 = arith.constant 0 : i32
    %c0_i32_1 = arith.constant 0 : i32
    return %c0_i32, %c0_i32_0 : i32, i32
  }
  func.func @transform_4(%arg0: i32) -> (i32, i32) {
    %c0_i32 = arith.constant 0 : i32
    %c0_i32_0 = arith.constant 0 : i32
    %c0_i32_1 = arith.constant 0 : i32
    return %c0_i32, %c0_i32_0 : i32, i32
  }
  func.func @transform_5(%arg0: i32) -> (i32, i32) {
    %c0_i32 = arith.constant 0 : i32
    %c0_i32_0 = arith.constant 0 : i32
    return %arg0, %c0_i32 : i32, i32
  }
}

</mosaic_0001>

<bundles_post_ra>
// kernel: tpu_custom_call.1
= control target key start
LH: loop header
LB: loop body
LE: loop exit
PB: predicated region body
PF: predicated region fallthrough
CT: control target
= control target key end

     0   :  { %10 = vsyncpa [#allocation3], 0  ;;  %s473_s0 = inlined_call_operand.hbm [shape: f32[8,16], index: 0, kind: input, shape index: {}]   ;;  %s474_s1 = inlined_call_operand.hbm [shape: bf16[16,128], index: 1, kind: input, shape index: {}]   ;;  %s475_s2 = inlined_call_operand.vmem [shape: f32[1,128], index: 2, kind: input, shape index: {}]   ;;  %s476_s3 = inlined_call_operand.hbm [shape: bf16[128,128], index: 3, kind: input, shape index: {}]   ;;  %s477_s4 = inlined_call_operand.vmem [shape: f32[1,128], index: 4, kind: input, shape index: {}]   ;;  %s478_s5 = inlined_call_operand.hbm [shape: f32[8,128], index: 5, kind: output, shape index: {}]  }
   0x1   :  { %11 = vsyncpa [#allocation6], 0 }
   0x2   :  { %12 = vsyncpa [#allocation4], 0  ;;  %s417_s18 = smov [#allocation5]  }
   0x3   :  { %s28_s19 = sshll.u32 %s417_s18, 4  ;;  %s29_s19 = int_to_ptr.vmem [resolvable:$true] %s28_s19 }
   0x4   :  { %s339_s20 = scalar_lea.vmem %s29_s19, 128  ;;  %p344_p1 = scmp.lt.s32.totalorder %s29_s19, %s29_s19 }
   0x5   :  { %p340_p0 = scmp.ne.s32.totalorder %s29_s19, %s339_s20  ;;  %p345_p2 = scmp.lt.s32.totalorder %s339_s20, %s339_s20 }
   0x7   :  { %p346_p3 = por %p345_p2, %p344_p1 }
   0x9   :  { %p347_p4 = pnand %p346_p3, %p340_p0 }
   0xb   :  { %350 = shalt.err (!%p347_p4)
}
   0xc   :  { %s418_s21 = smov 64   ;;  %s419_s22 = smov 4  }
   0xd   :  { %34 = dma.hbm_to_vmem [thread:$0]  %s474_s1, 128, %s29_s19, [#allocation6], %s418_s21, %s418_s21, %s419_s22  }
   0xe   :  { %s420_s25 = smov [#allocation2]   ;;  %s421_s27 = smov [#allocation7]  }
   0xf   :  { %s19_s26 = sshll.u32 %s420_s25, 4  ;;  %s42_s28 = sshll.u32 %s421_s27, 4  ;;  %s20_s26 = int_to_ptr.vmem [resolvable:$true] %s19_s26  ;;  %s43_s28 = int_to_ptr.vmem [resolvable:$true] %s42_s28 }
  0x10   :  { %s359_s29 = scalar_lea.vmem %s20_s26, 128  ;;  %p364_p6 = scmp.lt.s32.totalorder %s20_s26, %s20_s26 }
  0x11   :  { %p360_p5 = scmp.ne.s32.totalorder %s20_s26, %s359_s29  ;;  %p365_p7 = scmp.lt.s32.totalorder %s359_s29, %s359_s29 }
  0x13   :  { %p366_p8 = por %p365_p7, %p364_p6 }
  0x15   :  { %p367_p9 = pnand %p366_p8, %p360_p5 }
  0x17   :  { %370 = shalt.err (!%p367_p9)
}
  0x18   :  { %22 = dma.hbm_to_vmem [thread:$0]  %s473_s0, 128, %s20_s26, [#allocation3]  }
  0x19   :  { %s379_s7 = scalar_lea.vmem %s43_s28, 1024  ;;  %p384_p11 = scmp.lt.s32.totalorder %s43_s28, %s43_s28 }
  0x1a   :  { %p380_p10 = scmp.ne.s32.totalorder %s43_s28, %s379_s7  ;;  %p385_p12 = scmp.lt.s32.totalorder %s379_s7, %s379_s7 }
  0x1c   :  { %p386_p13 = por %p385_p12, %p384_p11 }
  0x1e   :  { %p387_p0 = pnand %p386_p13, %p380_p10 }
  0x20   :  { %390 = shalt.err (!%p387_p0)
}
  0x21   :  { %48 = dma.hbm_to_vmem [thread:$0]  %s476_s3, 1024, %s43_s28, [#allocation6], %s418_s21, %s418_s21, %s419_s22  }
  0x22   :  { %411 = dma.done.wait [#allocation3], 128  }
  0x23   :  { %412 = vsyncadd [#allocation3], 4294967168 }
  0x24   :  { %413 = dma.done.wait [#allocation6], 1152  }
  0x25   :  { %414 = vsyncadd [#allocation6], 4294966144  ;;  %v422_v0 = vmov 0.0   ;;  %vm423_vm0 = vmmov 0   ;;  %v318_v1 = vld [vmem:[#allocation5] sm:$0xff]   ;;  %v61_v2 = vld [vmem:[#allocation2] sm:$0xff] }
  0x26   :  { %284 = vmatprep.subr.bf16.mxu0 %v422_v0  ;;  %286 = vmatprep.mubr.msk.bf16.mxu0 %vm423_vm0, %v422_v0  ;;  %v62_v3 = vpack.c.bf16 %v61_v2, %v61_v2  ;;  %vm78_vm1 = vcmask 130048   ;;  %v319_v4 = vld [vmem:[#allocation7 + $0x38] sm:$0xff]   ;;  %v320_v5 = vld [vmem:[#allocation7 + $0x30] sm:$0xff]   ;;  %v321_v6 = vld [vmem:[#allocation7 + $0x28] sm:$0xff]  }
  0x27   :  { %290 = vmatprep.subr.bf16.mxu1 %v422_v0  ;;  %306 = vmatprep.mubr.msk.bf16.mxu1 %vm423_vm0, %v422_v0  ;;  %v322_v7 = vld [vmem:[#allocation7 + $0x20] sm:$0xff]   ;;  %v323_v8 = vld [vmem:[#allocation7 + $0x18] sm:$0xff]   ;;  %v324_v9 = vld [vmem:[#allocation7 + $0x10] sm:$0xff]  }
  0x28   :  { %285 = vmatpush3.bf16.msra.mxu0 %v318_v1  ;;  %291 = vmatpush3.bf16.msra.mxu1 %v319_v4  ;;  %v325_v10 = vld [vmem:[#allocation7 + $0x8] sm:$0xff]   ;;  %v326_v11 = vld [vmem:[#allocation7] sm:$0xff]   ;;  %v261_v12 = vld [vmem:[%s475_s2] ss:$0 sm:$0xff]  ;;  %s424_s2 = smov [#allocation8]  }
  0x29   :  { %292 = vmatprep.subr.bf16.mxu1 %v422_v0  ;;  %v264_v20 = vld [vmem:[%s477_s4] ss:$0 sm:$0xff]  ;;  %s251_s11 = sshll.u32 %s424_s2, 4  ;;  %s252_s11 = int_to_ptr.vmem [resolvable:$true] %s251_s11 }
  0x2a   :  { %s391_s4 = scalar_lea.vmem %s252_s11, 128  ;;  %p396_p2 = scmp.lt.s32.totalorder %s252_s11, %s252_s11 }
  0x2b   :  { %287 = vmatmul.mubr.msk.bf16.vlgmr.msra.gmra.mxu0 %vm78_vm1, %v62_v3  ;;  %p392_p1 = scmp.ne.s32.totalorder %s252_s11, %s391_s4  ;;  %p397_p3 = scmp.lt.s32.totalorder %s391_s4, %s391_s4 }
  0x2c   :  { %293 = vmatpush3.bf16.msra.mxu1 %v320_v5 }
  0x2d   :  { %294 = vmatprep.subr.bf16.mxu1 %v422_v0  ;;  %p398_p4 = por %p397_p3, %p396_p2 }
  0x2f   :  { %p399_p5 = pnand %p398_p4, %p392_p1 }
  0x30   :  { %295 = vmatpush3.bf16.msra.mxu1 %v321_v6 }
  0x31   :  { %296 = vmatprep.subr.bf16.mxu1 %v422_v0 }
  0x34   :  { %297 = vmatpush3.bf16.msra.mxu1 %v322_v7 }
  0x35   :  { %298 = vmatprep.subr.bf16.mxu1 %v422_v0 }
  0x38   :  { %299 = vmatpush3.bf16.msra.mxu1 %v323_v8 }
  0x39   :  { %300 = vmatprep.subr.bf16.mxu1 %v422_v0 }
  0x3c   :  { %301 = vmatpush3.bf16.msra.mxu1 %v324_v9 }
  0x3d   :  { %302 = vmatprep.subr.bf16.mxu1 %v422_v0 }
  0x40   :  { %303 = vmatpush3.bf16.msra.mxu1 %v325_v10 }
  0x41   :  { %304 = vmatprep.subr.bf16.mxu1 %v422_v0 }
  0x44   :  { %305 = vmatpush3.bf16.msra.mxu1 %v326_v11 }
  0xeb   :  { %v116_v13 = vpop.f32.mrf.mxu0 }
  0xec   :  { %v117_v14 = vadd.f32 %v261_v12, %v116_v13 }
  0xed   :  { %v288_v15 = vpop.f32.mrf.mxu0 }
  0xee   :  { %v122_v16 = vmax.f32 %v117_v14, 0.0 }
  0xef   :  { %v119_v17 = vpop.f32.mrf.mxu0 }
  0xf0   :  { %v123_v18 = vpack.c.bf16 %v122_v16, %v122_v16 }
  0xf1   :  { %v289_v19 = vpop.f32.mrf.mxu0 }
  0xf2   :  { %307 = vmatmul.mubr.bf16.vlgmr.msra.gmra.mxu1 %v123_v18 }
 0x1b2   :  { %v229_v21 = vpop.f32.mrf.mxu1 }
 0x1b3   :  { %v230_v22 = vadd.f32 %v264_v20, %v229_v21 }
 0x1b4   :  { %v308_v23 = vpop.f32.mrf.mxu1 }
 0x1b5   :  { %235 = vmax.xlane.f32.xlu0 %v230_v22 }
 0x1b6   :  { %v232_v24 = vpop.f32.mrf.mxu1 }
 0x1b8   :  { %v309_v25 = vpop.f32.mrf.mxu1 }
 0x23e   :  { %v236_v26 = vpop.xlane.xlu0 %235 }
 0x23f   :  { %v237_v27 = vsub.f32 %v230_v22, %v236_v26 }
 0x241   :  { %v238_v28 = vmul.f32 1.442695, %v237_v27 }
 0x243   :  { %327 = vpow2.f32 %v238_v28 }
 0x250   :  { %v328_v29 = vpop.eup %327 }
 0x251   :  { %240 = vadd.xlane.f32.xlu0 %v328_v29 }
 0x2da   :  { %v241_v30 = vpop.xlane.xlu0 %240 }
 0x2db   :  { %329 = vrcp.f32 %v241_v30 }
 0x2e8   :  { %v330_v31 = vpop.eup %329 }
 0x2e9   :  { %v243_v32 = vmul.f32 %v330_v31, %v328_v29 }
 0x2eb   :  { %244 = vst [vmem:[#allocation8] sm:$0xff] %v243_v32 }
 0x2ec   :  { %402 = shalt.err (!%p399_p5)
}
 0x2ed   :  { %254 = dma.vmem_to_hbm [thread:$0]  %s252_s11, 128, %s478_s5, [#allocation4]  }
 0x2ee   :  { %415 = dma.done.wait [#allocation4], 128  }
 0x2ef   :  { %416 = vsyncadd [#allocation4], 4294967168 }
 0x2f0   :  { %258 = vsyncpa [#allocation3], 1 }
 0x2f1   :  { %259 = vsyncpa [#allocation6], 1 }
 0x2f2   :  { %260 = vsyncpa [#allocation4], 1 }

</bundles_post_ra>
